<compile_context>
chip_gen: v6e
topology: v6e:2x2x1
jax: 0.10.0
libtpu: 0.0.40
codegen_flags: <defaults>
</compile_context>

<pallas_src>
import functools

import jax
import jax.numpy as jnp
from jax.experimental import pallas as pl
from jax.experimental.pallas import tpu as pltpu


def _silu(h):
    # SiLU with a single EUP push: sigmoid(h) = 0.5 * (1 + tanh(h / 2)).
    return h * (jnp.tanh(h * 0.5) * 0.5 + 0.5)


def feedforward_block_kernel(x_ref, gamma_ref, beta_ref,
                             w1_ref, b1_ref, w2_ref, b2_ref, w3_ref, b3_ref,
                             o_ref, xnorm_ref, h2_acc_ref, *, acts_dtype):
    """One (row-tile, hidden-chunk) grid step of the FeedforwardBlock forward.

      y = silu( W3 @ silu( W2 @ silu( W1 @ LN(x) + b1 ) + b2 ) + b3 + x )

    The hidden dimension of the first two Linears is streamed over grid axis 1
    (last, "arbitrary"); h2 is accumulated in f32 VMEM scratch.  The residual
    skip is the pre-LayerNorm block input, matching the PyTorch module.
    """
    kc = pl.program_id(1)
    nk = pl.num_programs(1)

    @pl.when(kc == 0)
    def _init():
        x = x_ref[...].astype(jnp.float32)                       # (tm, D)
        # nn.LayerNorm(in_dim), eps=1e-5, elementwise affine; two-pass variance
        # (no E[x^2]-mean^2 cancellation).
        mean = jnp.mean(x, axis=-1, keepdims=True)
        xc = x - mean
        var = jnp.mean(xc * xc, axis=-1, keepdims=True)
        x_norm = xc * jax.lax.rsqrt(var + 1e-5)
        x_norm = x_norm * gamma_ref[...] + beta_ref[...]
        xnorm_ref[...] = x_norm.astype(xnorm_ref.dtype)          # bf16 MXU feed
        h2_acc_ref[...] = jnp.zeros_like(h2_acc_ref)

    # feedforward[0] chunk:  h1_c = silu(x_norm @ W1[:, c] + b1[c])
    h1 = jnp.dot(xnorm_ref[...], w1_ref[...],
                 preferred_element_type=jnp.float32) + b1_ref[...]
    h1 = _silu(h1.astype(acts_dtype))
    # feedforward[1] partial reduction:  h2 += h1_c @ W2[c, :]
    h2_acc_ref[...] += jnp.dot(h1.astype(jnp.bfloat16), w2_ref[...],
                               preferred_element_type=jnp.float32)

    @pl.when(kc == nk - 1)
    def _finish():
        h2 = _silu((h2_acc_ref[...] + b2_ref[...]).astype(acts_dtype))
        # ResidualLinearLayer: Linear(in->in) + skip (= pre-norm block input) + SiLU.
        h3 = jnp.dot(h2.astype(jnp.bfloat16), w3_ref[...],
                     preferred_element_type=jnp.float32) + b3_ref[...]
        h3 = h3 + x_ref[...].astype(jnp.float32)
        o_ref[...] = _silu(h3).astype(o_ref.dtype)


def _round_up(a, b):
    return (a + b - 1) // b * b


def feedforward_block(x, params, *, max_tm=256):
    """x: [B, S, D] float32.  params: dict from init_params (bf16 weights)."""
    B, S, D = x.shape
    M = B * S
    x2 = x.reshape(M, D)

    # --- device-generation knobs ---------------------------------------------
    try:
        dev_kind = jax.devices()[0].device_kind.lower()
    except Exception:
        dev_kind = ""
    is_v5 = "v5" in dev_kind
    is_v7 = "v7" in dev_kind
    # bf16 VPU/EUP on v6e/v7x for the inner activation chain; f32 on v5e.
    acts_dtype = jnp.float32 if is_v5 else jnp.bfloat16

    try:
        vmem_cap = int(pltpu.get_tpu_info().vmem_capacity_bytes)
    except Exception:
        vmem_cap = 64 * 1024 * 1024  # conservative (v7x per-TC) fallback

    # --- parameters (weights already bf16 from init_params; casts are no-ops) --
    gamma = params["ln_gamma"].reshape(1, D).astype(jnp.float32)
    beta = params["ln_beta"].reshape(1, D).astype(jnp.float32)
    w1 = params["w1"].astype(jnp.bfloat16)
    w2 = params["w2"].astype(jnp.bfloat16)
    w3 = params["w3"].astype(jnp.bfloat16)
    b1 = params["b1"].reshape(1, -1).astype(jnp.float32)
    b2 = params["b2"].reshape(1, -1).astype(jnp.float32)
    b3 = params["b3"].reshape(1, -1).astype(jnp.float32)
    H = w1.shape[1]

    # --- row tile: multiple of 16 (packed bf16 sublanes); divide M if possible -
    tm_cap = min(max_tm, _round_up(M, 16))
    tm = None
    for cand in range(tm_cap, 15, -16):
        if M % cand == 0:
            tm = cand
            break
    if tm is None:
        tm = tm_cap
    # On v7x prefer an even number of row tiles so both TensorCores get equal work.
    if is_v7 and tm % 32 == 0 and M % tm == 0 and (M // tm) % 2 == 1:
        tm //= 2
    Mp = _round_up(M, tm)
    if Mp != M:
        # TODO(synk): replace the pad + slice round trip with a masked store on the
        # final partial row tile.
        x2 = jnp.pad(x2, ((0, Mp - M), (0, 0)))
    num_m = Mp // tm

    # --- hidden chunk: keep W1/W2 resident when they fit, else stream chunks ---
    def footprint(hc, nchunks):
        wbuf = 2 if nchunks > 1 else 1
        fp = 0
        fp += 2 * tm * D * 4 * 2          # x / out tiles, double-buffered, f32
        fp += wbuf * D * hc * 2           # W1 chunk(s), bf16
        fp += wbuf * hc * D * 2           # W2 chunk(s), bf16
        fp += D * D * 2                   # W3 resident, bf16
        fp += tm * D * 2                  # x_norm scratch, bf16
        fp += tm * D * 4                  # h2 accumulator scratch, f32
        fp += 8 * D * 4 + 2 * hc * 4      # LN affine + biases
        fp += 2 * tm * max(hc, D) * 4     # live elementwise intermediates
        return fp

    budget = int(vmem_cap * 0.8)
    Hc, nk = H, 1
    if footprint(H, 1) > budget:
        for cand in (1024, 512, 384, 256, 128):
            if cand < H and H % cand == 0 and footprint(cand, H // cand) <= budget:
                Hc, nk = cand, H // cand
                break
        # TODO(synk): if even Hc=128 does not fit (very large D), also shrink tm and
        # tile W3 over an output-column grid axis.

    vmem_limit = max(int(footprint(Hc, nk) * 1.4) + (2 << 20), 32 << 20)
    vmem_limit = min(vmem_limit, int(vmem_cap * 0.9))

    # --- BlockSpecs -------------------------------------------------------------
    w_mode = pl.Buffered(2) if nk > 1 else pl.Buffered(1)

    def const_spec(shape):
        return pl.BlockSpec(shape, lambda i, k: (0, 0), pipeline_mode=pl.Buffered(1))

    m_sem = (pltpu.CORE_PARALLEL
             if (is_v7 and num_m >= 2 and num_m % 2 == 0)
             else pltpu.PARALLEL)

    kernel = functools.partial(feedforward_block_kernel, acts_dtype=acts_dtype)

    out2 = pl.pallas_call(
        kernel,
        out_shape=jax.ShapeDtypeStruct((Mp, D), x.dtype),
        grid_spec=pltpu.PrefetchScalarGridSpec(
            num_scalar_prefetch=0,
            grid=(num_m, nk),
            in_specs=[
                pl.BlockSpec((tm, D), lambda i, k: (i, 0)),                       # x row tile
                const_spec((1, D)), const_spec((1, D)),                           # LN gamma, beta
                pl.BlockSpec((D, Hc), lambda i, k: (0, k), pipeline_mode=w_mode),  # W1 chunk
                pl.BlockSpec((1, Hc), lambda i, k: (0, k), pipeline_mode=w_mode),  # b1 chunk
                pl.BlockSpec((Hc, D), lambda i, k: (k, 0), pipeline_mode=w_mode),  # W2 chunk
                const_spec((1, D)),                                               # b2
                const_spec((D, D)),                                               # W3 (resident)
                const_spec((1, D)),                                               # b3
            ],
            out_specs=pl.BlockSpec((tm, D), lambda i, k: (i, 0)),
            scratch_shapes=[
                pltpu.VMEM((tm, D), jnp.bfloat16),   # x_norm (MXU feed)
                pltpu.VMEM((tm, D), jnp.float32),    # h2 accumulator
            ],
        ),
        compiler_params=pltpu.CompilerParams(
            dimension_semantics=(m_sem, pltpu.ARBITRARY),
            vmem_limit_bytes=vmem_limit,
        ),
    )(x2, gamma, beta, w1, b1, w2, b2, w3, b3)

    out = out2[:M] if Mp != M else out2
    return out.reshape(B, S, D)


def init_params(key, in_dim, hidden_dim):
    """Deterministic init matching the PyTorch layer shapes (Kaiming-uniform-ish).

    Weights are stored (in_dim, out_dim) so the kernel computes x @ W + b
    (PyTorch nn.Linear stores (out, in) and does x @ W.T), and are pre-cast to
    bf16 once here so there is no per-call cast / HBM round trip.
    """
    ks = jax.random.split(key, 6)

    def lin(kw, kb, fan_in, fan_out):
        bound = 1.0 / jnp.sqrt(fan_in)
        w = jax.random.uniform(kw, (fan_in, fan_out), jnp.float32, -bound, bound)
        b = jax.random.uniform(kb, (fan_out,), jnp.float32, -bound, bound)
        return w.astype(jnp.bfloat16), b

    w1, b1 = lin(ks[0], ks[1], in_dim, hidden_dim)   # feedforward[0]
    w2, b2 = lin(ks[2], ks[3], hidden_dim, in_dim)   # feedforward[1]
    w3, b3 = lin(ks[4], ks[5], in_dim, in_dim)       # feedforward_res.linear
    return {
        "ln_gamma": jnp.ones((in_dim,), jnp.float32),
        "ln_beta": jnp.zeros((in_dim,), jnp.float32),
        "w1": w1, "b1": b1,
        "w2": w2, "b2": b2,
        "w3": w3, "b3": b3,
    }


if __name__ == "__main__":
    # Small test shapes; the module defaults are in_dim=hidden_dim=512.
    B, S, D, H = 2, 8, 32, 64
    key = jax.random.PRNGKey(0)
    kx, kp = jax.random.split(key)
    x = jax.random.normal(kx, (B, S, D), jnp.float32)
    params = init_params(kp, D, H)

    out = feedforward_block(x, params)
    jax.block_until_ready(out)
    print("KERNEL_OK")
</pallas_src>

<mosaic_0001>
module attributes {stable_mosaic.version = 11 : i64} {
  func.func @feedforward_block_kernel(%arg0: i32, %arg1: i32, %arg2: memref<16x32xf32, #tpu.memory_space<vmem>>, %arg3: memref<1x32xf32, #tpu.memory_space<vmem>>, %arg4: memref<1x32xf32, #tpu.memory_space<vmem>>, %arg5: memref<32x64xbf16, #tpu.memory_space<vmem>>, %arg6: memref<1x64xf32, #tpu.memory_space<vmem>>, %arg7: memref<64x32xbf16, #tpu.memory_space<vmem>>, %arg8: memref<1x32xf32, #tpu.memory_space<vmem>>, %arg9: memref<32x32xbf16, #tpu.memory_space<vmem>>, %arg10: memref<1x32xf32, #tpu.memory_space<vmem>>, %arg11: memref<16x32xf32, #tpu.memory_space<vmem>>, %arg12: memref<16x32xbf16, #tpu.memory_space<vmem>>, %arg13: memref<16x32xf32, #tpu.memory_space<vmem>>) attributes {dimension_semantics = [#tpu.dimension_semantics<parallel>, #tpu.dimension_semantics<arbitrary>], iteration_bounds = array<i64: 1, 1>, scalar_prefetch = 0 : i64, scratch_operands = 2 : i64, tpu.core_type = #tpu.core_type<tc>, window_params = [{transform_indices = @transform_0, window_bounds = array<i64: 16, 32>}, {pipeline_mode = #tpu.pipeline_mode<synchronous>, transform_indices = @transform_1, window_bounds = array<i64: 1, 32>}, {pipeline_mode = #tpu.pipeline_mode<synchronous>, transform_indices = @transform_2, window_bounds = array<i64: 1, 32>}, {pipeline_mode = #tpu.pipeline_mode<synchronous>, transform_indices = @transform_3, window_bounds = array<i64: 32, 64>}, {pipeline_mode = #tpu.pipeline_mode<synchronous>, transform_indices = @transform_4, window_bounds = array<i64: 1, 64>}, {pipeline_mode = #tpu.pipeline_mode<synchronous>, transform_indices = @transform_5, window_bounds = array<i64: 64, 32>}, {pipeline_mode = #tpu.pipeline_mode<synchronous>, transform_indices = @transform_6, window_bounds = array<i64: 1, 32>}, {pipeline_mode = #tpu.pipeline_mode<synchronous>, transform_indices = @transform_7, window_bounds = array<i64: 32, 32>}, {pipeline_mode = #tpu.pipeline_mode<synchronous>, transform_indices = @transform_8, window_bounds = array<i64: 1, 32>}, {transform_indices = @transform_9, window_bounds = array<i64: 16, 32>}]} {
    %c0_i32 = arith.constant 0 : i32
    %0 = arith.cmpi eq, %arg1, %c0_i32 : i32
    %1 = arith.extui %0 : i1 to i32
    %c0_i32_0 = arith.constant 0 : i32
    %2 = arith.cmpi ne, %1, %c0_i32_0 : i32
    scf.if %2 {
      %c0_18 = arith.constant 0 : index
      %c0_19 = arith.constant 0 : index
      %26 = vector.load %arg2[%c0_18, %c0_19] : memref<16x32xf32, #tpu.memory_space<vmem>>, vector<16x32xf32>
      %cst_20 = arith.constant dense<0.000000e+00> : vector<16xf32>
      %27 = vector.multi_reduction <add>, %26, %cst_20 [1] : vector<16x32xf32> to vector<16xf32>
      %28 = vector.shape_cast %27 : vector<16xf32> to vector<16x1xf32>
      %cst_21 = arith.constant 3.200000e+01 : f32
      %29 = vector.broadcast %cst_21 : f32 to vector<16x1xf32>
      %30 = arith.divf %28, %29 : vector<16x1xf32>
      %31 = vector.broadcast %30 : vector<16x1xf32> to vector<16x32xf32>
      %32 = arith.subf %26, %31 : vector<16x32xf32>
      %33 = arith.mulf %32, %32 : vector<16x32xf32>
      %cst_22 = arith.constant dense<0.000000e+00> : vector<16xf32>
      %34 = vector.multi_reduction <add>, %33, %cst_22 [1] : vector<16x32xf32> to vector<16xf32>
      %35 = vector.shape_cast %34 : vector<16xf32> to vector<16x1xf32>
      %cst_23 = arith.constant 3.200000e+01 : f32
      %36 = vector.broadcast %cst_23 : f32 to vector<16x1xf32>
      %37 = arith.divf %35, %36 : vector<16x1xf32>
      %cst_24 = arith.constant 9.99999974E-6 : f32
      %38 = vector.broadcast %cst_24 : f32 to vector<16x1xf32>
      %39 = arith.addf %37, %38 : vector<16x1xf32>
      %40 = math.rsqrt %39 : vector<16x1xf32>
      %41 = vector.broadcast %40 : vector<16x1xf32> to vector<16x32xf32>
      %42 = arith.mulf %32, %41 : vector<16x32xf32>
      %c0_25 = arith.constant 0 : index
      %c0_26 = arith.constant 0 : index
      %43 = vector.load %arg3[%c0_25, %c0_26] : memref<1x32xf32, #tpu.memory_space<vmem>>, vector<1x32xf32>
      %44 = vector.broadcast %43 : vector<1x32xf32> to vector<16x32xf32>
      %45 = arith.mulf %42, %44 : vector<16x32xf32>
      %c0_27 = arith.constant 0 : index
      %c0_28 = arith.constant 0 : index
      %46 = vector.load %arg4[%c0_27, %c0_28] : memref<1x32xf32, #tpu.memory_space<vmem>>, vector<1x32xf32>
      %47 = vector.broadcast %46 : vector<1x32xf32> to vector<16x32xf32>
      %48 = arith.addf %45, %47 : vector<16x32xf32>
      %49 = arith.truncf %48 : vector<16x32xf32> to vector<16x32xbf16>
      %c0_29 = arith.constant 0 : index
      %c0_30 = arith.constant 0 : index
      %50 = vector.load %arg12[%c0_29, %c0_30] : memref<16x32xbf16, #tpu.memory_space<vmem>>, vector<16x32xbf16>
      tpu.vector_store %arg12[%c0_29, %c0_30], %49 {strides = array<i32>} : memref<16x32xbf16, #tpu.memory_space<vmem>>, vector<16x32xbf16>,
      %cst_31 = arith.constant 0.000000e+00 : f32
      %51 = vector.broadcast %cst_31 : f32 to vector<16x32xf32>
      %c0_32 = arith.constant 0 : index
      %c0_33 = arith.constant 0 : index
      %52 = vector.load %arg13[%c0_32, %c0_33] : memref<16x32xf32, #tpu.memory_space<vmem>>, vector<16x32xf32>
      tpu.vector_store %arg13[%c0_32, %c0_33], %51 {strides = array<i32>} : memref<16x32xf32, #tpu.memory_space<vmem>>, vector<16x32xf32>,
    } else {
    }
    %c0 = arith.constant 0 : index
    %c0_1 = arith.constant 0 : index
    %3 = vector.load %arg12[%c0, %c0_1] : memref<16x32xbf16, #tpu.memory_space<vmem>>, vector<16x32xbf16>
    %c0_2 = arith.constant 0 : index
    %c0_3 = arith.constant 0 : index
    %4 = vector.load %arg5[%c0_2, %c0_3] : memref<32x64xbf16, #tpu.memory_space<vmem>>, vector<32x64xbf16>
    %cst = arith.constant dense<0.000000e+00> : vector<16x64xf32>
    %5 = tpu.matmul %3, %4, %cst {dimension_numbers = #tpu.dot_dimension_numbers<[1], [0], [0], [1], [0, 0, 1, 1], [], []>} : vector<16x32xbf16>, vector<32x64xbf16>, vector<16x64xf32> -> vector<16x64xf32>
    %c0_4 = arith.constant 0 : index
    %c0_5 = arith.constant 0 : index
    %6 = vector.load %arg6[%c0_4, %c0_5] : memref<1x64xf32, #tpu.memory_space<vmem>>, vector<1x64xf32>
    %7 = vector.broadcast %6 : vector<1x64xf32> to vector<16x64xf32>
    %8 = arith.addf %5, %7 : vector<16x64xf32>
    %9 = arith.truncf %8 : vector<16x64xf32> to vector<16x64xbf16>
    %cst_6 = arith.constant 5.000000e-01 : bf16
    %10 = vector.broadcast %cst_6 : bf16 to vector<16x64xbf16>
    %11 = arith.mulf %9, %10 : vector<16x64xbf16>
    %12 = math.tanh %11 : vector<16x64xbf16>
    %cst_7 = arith.constant 5.000000e-01 : bf16
    %13 = vector.broadcast %cst_7 : bf16 to vector<16x64xbf16>
    %14 = arith.mulf %12, %13 : vector<16x64xbf16>
    %cst_8 = arith.constant 5.000000e-01 : bf16
    %15 = vector.broadcast %cst_8 : bf16 to vector<16x64xbf16>
    %16 = arith.addf %14, %15 : vector<16x64xbf16>
    %17 = arith.mulf %9, %16 : vector<16x64xbf16>
    %c0_9 = arith.constant 0 : index
    %c0_10 = arith.constant 0 : index
    %18 = vector.load %arg13[%c0_9, %c0_10] : memref<16x32xf32, #tpu.memory_space<vmem>>, vector<16x32xf32>
    %c0_11 = arith.constant 0 : index
    %c0_12 = arith.constant 0 : index
    %19 = vector.load %arg7[%c0_11, %c0_12] : memref<64x32xbf16, #tpu.memory_space<vmem>>, vector<64x32xbf16>
    %cst_13 = arith.constant dense<0.000000e+00> : vector<16x32xf32>
    %20 = tpu.matmul %17, %19, %cst_13 {dimension_numbers = #tpu.dot_dimension_numbers<[1], [0], [0], [1], [0, 0, 1, 1], [], []>} : vector<16x64xbf16>, vector<64x32xbf16>, vector<16x32xf32> -> vector<16x32xf32>
    %21 = arith.addf %18, %20 : vector<16x32xf32>
    %c0_14 = arith.constant 0 : index
    %c0_15 = arith.constant 0 : index
    %22 = vector.load %arg13[%c0_14, %c0_15] : memref<16x32xf32, #tpu.memory_space<vmem>>, vector<16x32xf32>
    tpu.vector_store %arg13[%c0_14, %c0_15], %21 {strides = array<i32>} : memref<16x32xf32, #tpu.memory_space<vmem>>, vector<16x32xf32>,
    %c0_i32_16 = arith.constant 0 : i32
    %23 = arith.cmpi eq, %arg1, %c0_i32_16 : i32
    %24 = arith.extui %23 : i1 to i32
    %c0_i32_17 = arith.constant 0 : i32
    %25 = arith.cmpi ne, %24, %c0_i32_17 : i32
    scf.if %25 {
      %c0_18 = arith.constant 0 : index
      %c0_19 = arith.constant 0 : index
      %26 = vector.load %arg13[%c0_18, %c0_19] : memref<16x32xf32, #tpu.memory_space<vmem>>, vector<16x32xf32>
      %c0_20 = arith.constant 0 : index
      %c0_21 = arith.constant 0 : index
      %27 = vector.load %arg8[%c0_20, %c0_21] : memref<1x32xf32, #tpu.memory_space<vmem>>, vector<1x32xf32>
      %28 = vector.broadcast %27 : vector<1x32xf32> to vector<16x32xf32>
      %29 = arith.addf %26, %28 : vector<16x32xf32>
      %30 = arith.truncf %29 : vector<16x32xf32> to vector<16x32xbf16>
      %cst_22 = arith.constant 5.000000e-01 : bf16
      %31 = vector.broadcast %cst_22 : bf16 to vector<16x32xbf16>
      %32 = arith.mulf %30, %31 : vector<16x32xbf16>
      %33 = math.tanh %32 : vector<16x32xbf16>
      %cst_23 = arith.constant 5.000000e-01 : bf16
      %34 = vector.broadcast %cst_23 : bf16 to vector<16x32xbf16>
      %35 = arith.mulf %33, %34 : vector<16x32xbf16>
      %cst_24 = arith.constant 5.000000e-01 : bf16
      %36 = vector.broadcast %cst_24 : bf16 to vector<16x32xbf16>
      %37 = arith.addf %35, %36 : vector<16x32xbf16>
      %38 = arith.mulf %30, %37 : vector<16x32xbf16>
      %c0_25 = arith.constant 0 : index
      %c0_26 = arith.constant 0 : index
      %39 = vector.load %arg9[%c0_25, %c0_26] : memref<32x32xbf16, #tpu.memory_space<vmem>>, vector<32x32xbf16>
      %cst_27 = arith.constant dense<0.000000e+00> : vector<16x32xf32>
      %40 = tpu.matmul %38, %39, %cst_27 {dimension_numbers = #tpu.dot_dimension_numbers<[1], [0], [0], [1], [0, 0, 1, 1], [], []>} : vector<16x32xbf16>, vector<32x32xbf16>, vector<16x32xf32> -> vector<16x32xf32>
      %c0_28 = arith.constant 0 : index
      %c0_29 = arith.constant 0 : index
      %41 = vector.load %arg10[%c0_28, %c0_29] : memref<1x32xf32, #tpu.memory_space<vmem>>, vector<1x32xf32>
      %42 = vector.broadcast %41 : vector<1x32xf32> to vector<16x32xf32>
      %43 = arith.addf %40, %42 : vector<16x32xf32>
      %c0_30 = arith.constant 0 : index
      %c0_31 = arith.constant 0 : index
      %44 = vector.load %arg2[%c0_30, %c0_31] : memref<16x32xf32, #tpu.memory_space<vmem>>, vector<16x32xf32>
      %45 = arith.addf %43, %44 : vector<16x32xf32>
      %cst_32 = arith.constant 5.000000e-01 : f32
      %46 = vector.broadcast %cst_32 : f32 to vector<16x32xf32>
      %47 = arith.mulf %45, %46 : vector<16x32xf32>
      %48 = math.tanh %47 : vector<16x32xf32>
      %cst_33 = arith.constant 5.000000e-01 : f32
      %49 = vector.broadcast %cst_33 : f32 to vector<16x32xf32>
      %50 = arith.mulf %48, %49 : vector<16x32xf32>
      %cst_34 = arith.constant 5.000000e-01 : f32
      %51 = vector.broadcast %cst_34 : f32 to vector<16x32xf32>
      %52 = arith.addf %50, %51 : vector<16x32xf32>
      %53 = arith.mulf %45, %52 : vector<16x32xf32>
      %c0_35 = arith.constant 0 : index
      %c0_36 = arith.constant 0 : index
      %54 = vector.load %arg11[%c0_35, %c0_36] : memref<16x32xf32, #tpu.memory_space<vmem>>, vector<16x32xf32>
      tpu.vector_store %arg11[%c0_35, %c0_36], %53 {strides = array<i32>} : memref<16x32xf32, #tpu.memory_space<vmem>>, vector<16x32xf32>,
    } else {
    }
    return
  }
  func.func @transform_0(%arg0: i32, %arg1: i32) -> (i32, i32) {
    %c0_i32 = arith.constant 0 : i32
    %c0_i32_0 = arith.constant 0 : i32
    return %arg0, %c0_i32 : i32, i32
  }
  func.func @transform_1(%arg0: i32, %arg1: i32) -> (i32, i32) {
    %c0_i32 = arith.constant 0 : i32
    %c0_i32_0 = arith.constant 0 : i32
    %c0_i32_1 = arith.constant 0 : i32
    return %c0_i32, %c0_i32_0 : i32, i32
  }
  func.func @transform_2(%arg0: i32, %arg1: i32) -> (i32, i32) {
    %c0_i32 = arith.constant 0 : i32
    %c0_i32_0 = arith.constant 0 : i32
    %c0_i32_1 = arith.constant 0 : i32
    return %c0_i32, %c0_i32_0 : i32, i32
  }
  func.func @transform_3(%arg0: i32, %arg1: i32) -> (i32, i32) {
    %c0_i32 = arith.constant 0 : i32
    %c0_i32_0 = arith.constant 0 : i32
    return %c0_i32, %arg1 : i32, i32
  }
  func.func @transform_4(%arg0: i32, %arg1: i32) -> (i32, i32) {
    %c0_i32 = arith.constant 0 : i32
    %c0_i32_0 = arith.constant 0 : i32
    return %c0_i32, %arg1 : i32, i32
  }
  func.func @transform_5(%arg0: i32, %arg1: i32) -> (i32, i32) {
    %c0_i32 = arith.constant 0 : i32
    %c0_i32_0 = arith.constant 0 : i32
    return %arg1, %c0_i32 : i32, i32
  }
  func.func @transform_6(%arg0: i32, %arg1: i32) -> (i32, i32) {
    %c0_i32 = arith.constant 0 : i32
    %c0_i32_0 = arith.constant 0 : i32
    %c0_i32_1 = arith.constant 0 : i32
    return %c0_i32, %c0_i32_0 : i32, i32
  }
  func.func @transform_7(%arg0: i32, %arg1: i32) -> (i32, i32) {
    %c0_i32 = arith.constant 0 : i32
    %c0_i32_0 = arith.constant 0 : i32
    %c0_i32_1 = arith.constant 0 : i32
    return %c0_i32, %c0_i32_0 : i32, i32
  }
  func.func @transform_8(%arg0: i32, %arg1: i32) -> (i32, i32) {
    %c0_i32 = arith.constant 0 : i32
    %c0_i32_0 = arith.constant 0 : i32
    %c0_i32_1 = arith.constant 0 : i32
    return %c0_i32, %c0_i32_0 : i32, i32
  }
  func.func @transform_9(%arg0: i32, %arg1: i32) -> (i32, i32) {
    %c0_i32 = arith.constant 0 : i32
    %c0_i32_0 = arith.constant 0 : i32
    return %arg0, %c0_i32 : i32, i32
  }
}

</mosaic_0001>

<bundles_post_ra>
// kernel: tpu_custom_call.1
= control target key start
LH: loop header
LB: loop body
LE: loop exit
PB: predicated region body
PF: predicated region fallthrough
CT: control target
= control target key end

     0   :  { %vm41_vm0 = vcmask 261120   ;;  %s632_s0 = inlined_call_operand.vmem [shape: f32[16,32], index: 0, kind: input, shape index: {}]   ;;  %s633_s1 = inlined_call_operand.vmem [shape: f32[1,32], index: 1, kind: input, shape index: {}]   ;;  %s634_s2 = inlined_call_operand.vmem [shape: f32[1,32], index: 2, kind: input, shape index: {}]   ;;  %s635_s3 = inlined_call_operand.vmem [shape: bf16[32,64], index: 3, kind: input, shape index: {}]   ;;  %s636_s4 = inlined_call_operand.vmem [shape: f32[1,64], index: 4, kind: input, shape index: {}]   ;;  %s637_s5 = inlined_call_operand.vmem [shape: bf16[64,32], index: 5, kind: input, shape index: {}]   ;;  %s638_s6 = inlined_call_operand.vmem [shape: f32[1,32], index: 6, kind: input, shape index: {}]   ;;  %s639_s7 = inlined_call_operand.vmem [shape: bf16[32,32], index: 7, kind: input, shape index: {}]   ;;  %s640_s8 = inlined_call_operand.vmem [shape: f32[1,32], index: 8, kind: input, shape index: {}]   ;;  %s641_s9 = inlined_call_operand.hbm [shape: f32[16,32], index: 9, kind: output, shape index: {}]  }
   0x1   :  { %v549_v0 = vld [vmem:[%s632_s0] sm:$0xff]  ;;  %v554_v1 = vld [vmem:[%s632_s0 + $0x8] sm:$0xff] }
   0x2   :  { %v42_v2 = vsel %vm41_vm0, %v549_v0, 0.0  ;;  %v45_v3 = vsel %vm41_vm0, %v554_v1, 0.0 }
   0x3   :  { %43 = vadd.xlane.f32.xlu0 %v42_v2 }
   0x7   :  { %46 = vadd.xlane.f32.xlu0 %v45_v3 }
   0x8   :  { %14 = vsyncpa [#allocation5], 0  ;;  %v448_v14 = vld [vmem:[%s635_s3 + $0x8] sm:$0xff]   ;;  %v491_v15 = vmov 0.0   ;;  %vm492_vm1 = vmmov 0   ;;  %v449_v16 = vld [vmem:[%s635_s3] sm:$0xff]  }
   0x9   :  { %415 = vmatprep.subr.bf16.mxu0 %v491_v15  ;;  %98 = vst.msk [vmem:[#allocation3] sm:$0xff] %vm41_vm0, %v491_v15  ;;  %99 = vst.msk [vmem:[#allocation3 + $0x8] sm:$0xff] %vm41_vm0, %v491_v15  ;;  %419 = vmatprep.mubr.msk.bf16.mxu0 %vm492_vm1, %v491_v15  ;;  %v383_v24 = vld [vmem:[%s633_s1] ss:$0 sm:$0xff]  ;;  %vm95_vm2 = vcmask 257024   ;;  %v451_v36 = vld [vmem:[%s637_s5 + $0x18] sm:$0xff]  }
   0xa   :  { %416 = vmatpush3.bf16.msra.mxu0 %v448_v14  ;;  %423 = vmatprep.subr.bf16.mxu1 %v491_v15  ;;  %v384_v26 = vld [vmem:[%s634_s2] ss:$0 sm:$0xff]  ;;  %v452_v37 = vld [vmem:[%s637_s5 + $0x10] sm:$0xff]   ;;  %v453_v38 = vld [vmem:[%s637_s5 + $0x8] sm:$0xff]   ;;  %vm215_vm3 = vcmask 523264  }
   0xb   :  { %417 = vmatprep.subr.bf16.mxu0 %v491_v15  ;;  %431 = vmatprep.mubr.msk.bf16.mxu1 %vm492_vm1, %v491_v15  ;;  %v454_v39 = vld [vmem:[%s637_s5] sm:$0xff]   ;;  %v455_v53 = vld [vmem:[%s639_s7 + $0x8] sm:$0xff]  }
   0xc   :  { %424 = vmatpush3.bf16.msra.mxu1 %v451_v36  ;;  %v387_v41 = vld [vmem:[%s636_s4] ss:$0 sm:$0xff] }
   0xd   :  { %425 = vmatprep.subr.bf16.mxu1 %v491_v15  ;;  %v456_v54 = vld [vmem:[%s639_s7] sm:$0xff]  }
   0xe   :  { %418 = vmatpush3.bf16.msra.mxu0 %v449_v16  ;;  %v397_v2 = vld [vmem:[%s638_s6] ss:$0 sm:$0xff]  ;;  %s493_s6 = smov [#allocation4]  }
   0xf   :  { %435 = vmatprep.subr.bf16.mxu0 %v491_v15 }
  0x10   :  { %426 = vmatpush3.bf16.msra.mxu1 %v452_v37  ;;  %v181_v55 = vld [vmem:[#allocation3] sm:$0xff]  ;;  %v182_v59 = vld [vmem:[#allocation3 + $0x8] sm:$0xff] }
  0x11   :  { %427 = vmatprep.subr.bf16.mxu1 %v491_v15 }
  0x14   :  { %428 = vmatpush3.bf16.msra.mxu1 %v453_v38 }
  0x15   :  { %429 = vmatprep.subr.bf16.mxu1 %v491_v15 }
  0x18   :  { %430 = vmatpush3.bf16.msra.mxu1 %v454_v39 }
  0x8c   :  { %v44_v4 = vpop.xlane.xlu0 %43 }
  0x8d   :  { %v49_v5 = vmul.f32 0.03125, %v44_v4 }
  0x8f   :  { %v51_v6 = vsub.f32 %v549_v0, %v49_v5 }
  0x90   :  { %v47_v7 = vpop.xlane.xlu0 %46 }
  0x91   :  { %v50_v8 = vmul.f32 0.03125, %v47_v7  ;;  %v53_v9 = vmul.f32 %v51_v6, %v51_v6 }
  0x93   :  { %v52_v10 = vsub.f32 %v554_v1, %v50_v8  ;;  %v55_v11 = vsel %vm41_vm0, %v53_v9, 0.0 }
  0x94   :  { %56 = vadd.xlane.f32.xlu1 %v55_v11 }
  0x95   :  { %v54_v12 = vmul.f32 %v52_v10, %v52_v10 }
  0x97   :  { %v58_v13 = vsel %vm41_vm0, %v54_v12, 0.0  ;;  %v398_v12 = vld [vmem:[%s640_s8] ss:$0 sm:$0xff]  ;;  %s372_s8 = sshll.u32 %s493_s6, 4  ;;  %s373_s8 = int_to_ptr.vmem [resolvable:$true] %s372_s8 }
  0x98   :  { %59 = vadd.xlane.f32.xlu1 %v58_v13  ;;  %s469_s11 = scalar_lea.vmem %s373_s8, 256  ;;  %p474_p1 = scmp.lt.s32.totalorder %s373_s8, %s373_s8 }
  0x99   :  { %p470_p0 = scmp.ne.s32.totalorder %s373_s8, %s469_s11  ;;  %p475_p2 = scmp.lt.s32.totalorder %s469_s11, %s469_s11 }
  0x9b   :  { %p476_p3 = por %p475_p2, %p474_p1 }
  0x9d   :  { %p477_p4 = pnand %p476_p3, %p470_p0 }
 0x11d   :  { %v57_v17 = vpop.xlane.xlu1 %56 }
 0x11e   :  { %v61_v18 = vmul.f32 0.03125, %v57_v17 }
 0x120   :  { %v63_v19 = vadd.f32 1e-05, %v61_v18 }
 0x121   :  { %v60_v20 = vpop.xlane.xlu1 %59 }
 0x122   :  { %457 = vrsqrt.f32 %v63_v19  ;;  %v62_v21 = vmul.f32 0.03125, %v60_v20 }
 0x124   :  { %v64_v22 = vadd.f32 1e-05, %v62_v21 }
 0x126   :  { %459 = vrsqrt.f32 %v64_v22 }
 0x12f   :  { %v458_v23 = vpop.eup %457 }
 0x130   :  { %v67_v25 = vmul.f32 %v458_v23, %v51_v6 }
 0x132   :  { %v76_v27 = vmul.f32 %v383_v24, %v67_v25 }
 0x133   :  { %v460_v28 = vpop.eup %459 }
 0x134   :  { %v85_v29 = vadd.f32 %v384_v26, %v76_v27  ;;  %v68_v30 = vmul.f32 %v460_v28, %v52_v10 }
 0x136   :  { %v402_v31 = vpack.c.bf16 %v85_v29, %v85_v29  ;;  %v77_v32 = vmul.f32 %v383_v24, %v68_v30 }
 0x138   :  { %96 = vst.msk [vmem:[#allocation2] sm:$0xf] %vm95_vm2, %v402_v31  ;;  %v86_v33 = vadd.f32 %v384_v26, %v77_v32 }
 0x13a   :  { %v403_v34 = vpack.c.bf16 %v86_v33, %v86_v33 }
 0x13c   :  { %97 = vst.msk [vmem:[#allocation2 + $0x4] sm:$0xf] %vm95_vm2, %v403_v34 }
 0x143   :  { %v450_v35 = vld [vmem:[#allocation2] sm:$0xff]  }
 0x144   :  { %420 = vmatmul.mubr.msk.bf16.vlgmr.msra.gmra.mxu0 %vm41_vm0, %v450_v35 }
 0x145   :  { %439 = vmatprep.mubr.msk.bf16.mxu0 %vm492_vm1, %v491_v15  ;;  %436 = vmatpush3.bf16.msra.mxu0 %v455_v53 }
 0x146   :  { %437 = vmatprep.subr.bf16.mxu0 %v491_v15 }
 0x149   :  { %438 = vmatpush3.bf16.msra.mxu0 %v456_v54 }
 0x204   :  { %v168_v40 = vpop.f32.mrf.mxu0 }
 0x205   :  { %v169_v44 = vadd.f32 %v387_v41, %v168_v40 }
 0x206   :  { %v421_v42 = vpop.f32.mrf.mxu0 }
 0x208   :  { %v171_v43 = vpop.f32.mrf.mxu0 }
 0x209   :  { %v172_v45 = vadd.f32 %v387_v41, %v171_v43 }
 0x20a   :  { %v422_v46 = vpop.f32.mrf.mxu0 }
 0x20b   :  { %v175_v47 = vpack.c.bf16 %v172_v45, %v169_v44 }
 0x20d   :  { %v176_v48 = vmul.bf16 1056980736, %v175_v47 }
 0x20f   :  { %461 = vtanh.bf16 %v176_v48 }
 0x21d   :  { %v462_v49 = vpop.eup %461 }
 0x21e   :  { %v178_v50 = vmul.bf16 1056980736, %v462_v49 }
 0x220   :  { %v179_v51 = vadd.bf16 1056980736, %v178_v50 }
 0x222   :  { %v180_v52 = vmul.bf16 %v179_v51, %v175_v47 }
 0x224   :  { %432 = vmatmul.mubr.msk.bf16.vlgmr.msra.gmra.mxu1 %vm215_vm3, %v180_v52 }
 0x2e4   :  { %v253_v56 = vpop.f32.mrf.mxu1 }
 0x2e5   :  { %v260_v57 = vadd.f32 %v253_v56, %v181_v55 }
 0x2e6   :  { %v433_v58 = vpop.f32.mrf.mxu1 }
 0x2e7   :  { %262 = vst.msk [vmem:[#allocation3] sm:$0xff] %vm41_vm0, %v260_v57 }
 0x2e8   :  { %v256_v60 = vpop.f32.mrf.mxu1 }
 0x2e9   :  { %v261_v61 = vadd.f32 %v256_v60, %v182_v59 }
 0x2ea   :  { %v434_v62 = vpop.f32.mrf.mxu1 }
 0x2eb   :  { %263 = vst.msk [vmem:[#allocation3 + $0x8] sm:$0xff] %vm41_vm0, %v261_v61 }
 0x2ee   :  { %v267_v63 = vld [vmem:[#allocation3] sm:$0xff] }
 0x2ef   :  { %v276_v4 = vadd.f32 %v397_v2, %v267_v63 }
 0x2f2   :  { %v268_v3 = vld [vmem:[#allocation3 + $0x8] sm:$0xff] }
 0x2f3   :  { %v277_v5 = vadd.f32 %v397_v2, %v268_v3 }
 0x2f5   :  { %v278_v6 = vpack.c.bf16 %v277_v5, %v276_v4 }
 0x2f7   :  { %v279_v7 = vmul.bf16 1056980736, %v278_v6 }
 0x2f9   :  { %463 = vtanh.bf16 %v279_v7 }
 0x307   :  { %v464_v8 = vpop.eup %463 }
 0x308   :  { %v281_v9 = vmul.bf16 1056980736, %v464_v8 }
 0x30a   :  { %v282_v10 = vadd.bf16 1056980736, %v281_v9 }
 0x30c   :  { %v283_v11 = vmul.bf16 %v282_v10, %v278_v6 }
 0x30e   :  { %440 = vmatmul.mubr.msk.bf16.vlgmr.msra.gmra.mxu0 %vm41_vm0, %v283_v11 }
 0x3ce   :  { %v344_v13 = vpop.f32.mrf.mxu0 }
 0x3cf   :  { %v345_v14 = vadd.f32 %v398_v12, %v344_v13 }
 0x3d0   :  { %v441_v15 = vpop.f32.mrf.mxu0 }
 0x3d1   :  { %v353_v16 = vadd.f32 %v345_v14, %v549_v0 }
 0x3d2   :  { %v347_v17 = vpop.f32.mrf.mxu0 }
 0x3d3   :  { %v355_v18 = vmul.f32 0.5, %v353_v16  ;;  %v348_v19 = vadd.f32 %v398_v12, %v347_v17 }
 0x3d4   :  { %v442_v20 = vpop.f32.mrf.mxu0 }
 0x3d5   :  { %465 = vtanh.f32 %v355_v18  ;;  %v354_v21 = vadd.f32 %v348_v19, %v554_v1 }
 0x3d7   :  { %v356_v22 = vmul.f32 0.5, %v354_v21 }
 0x3d9   :  { %467 = vtanh.f32 %v356_v22 }
 0x3e2   :  { %v466_v23 = vpop.eup %465 }
 0x3e3   :  { %v359_v24 = vmul.f32 0.5, %v466_v23 }
 0x3e5   :  { %v361_v25 = vadd.f32 0.5, %v359_v24 }
 0x3e6   :  { %v468_v26 = vpop.eup %467 }
 0x3e7   :  { %v363_v27 = vmul.f32 %v361_v25, %v353_v16  ;;  %v360_v28 = vmul.f32 0.5, %v468_v26 }
 0x3e9   :  { %365 = vst.msk [vmem:[#allocation4] sm:$0xff] %vm41_vm0, %v363_v27  ;;  %v362_v0 = vadd.f32 0.5, %v360_v28 }
 0x3eb   :  { %v364_v29 = vmul.f32 %v362_v0, %v354_v21 }
 0x3ed   :  { %366 = vst.msk [vmem:[#allocation4 + $0x8] sm:$0xff] %vm41_vm0, %v364_v29 }
 0x3ee   :  { %480 = shalt.err (!%p477_p4)
}
 0x3ef   :  { %s494_s12 = smov 128   ;;  %s495_s0 = smov 8  }
 0x3f0   :  { %378 = dma.vmem_to_hbm [thread:$0]  %s373_s8, 256, %s641_s9, [#allocation5], %s494_s12, %s494_s12, %s495_s0  }
 0x3f1   :  { %489 = dma.done.wait [#allocation5], 256  }
 0x3f2   :  { %490 = vsyncadd [#allocation5], 4294967040 }
 0x3f3   :  { %382 = vsyncpa [#allocation5], 1 }

</bundles_post_ra>
